<compile_context>
chip_gen: v7x
topology: tpu7x:2x2x1
jax: 0.10.0
libtpu: 0.0.40
codegen_flags: <defaults>
</compile_context>

<pallas_src>
import functools

import numpy as np
import jax
import jax.numpy as jnp
from jax.experimental import pallas as pl
from jax.experimental.pallas import tpu as pltpu


def _mil_atten_kernel(x_ref, tn_ref, v_ref, w_ref, feat_ref, soft_ref,
                      *, score_in_bf16):
    # x_ref:    (TB, N, D)  bags
    # tn_ref:   (TB, 1)     int32 valid-instance counts
    # v_ref:    (D, dl)
    # w_ref:    (1, dl)     W row, pre-scaled by 1/sqrt(dl)
    # feat_ref: (TB, D)
    # soft_ref: (TB, N)
    x3 = x_ref[...]                                   # (TB, N, D)
    tb, n, d = x3.shape
    dl = v_ref.shape[1]

    v = v_ref[...]                                    # (D, dl)
    w_row = w_ref[...].astype(jnp.float32)            # (1, dl)

    # ---- attention scores (MXU matmul + VPU lane reduce) --------------------
    x2 = x3.reshape(tb * n, d)                        # (TB*N, D)
    if score_in_bf16:
        x2 = x2.astype(jnp.bfloat16)
        v = v.astype(jnp.bfloat16)
    xv = jnp.tanh(jnp.dot(x2, v, preferred_element_type=jnp.float32))
    xv3 = xv.reshape(tb, n, dl)                       # (TB, N, dl) f32
    # VPU multiply + lane reduce instead of a 1-column MXU matmul; the
    # 1/sqrt(dl) scale is already folded into w_row.
    dis = jnp.sum(xv3 * w_row[None, :, :], axis=-1)   # (TB, N) f32

    # ---- mask: single broadcast compare against per-bag true_num ------------
    col = jax.lax.broadcasted_iota(jnp.int32, (tb, n), 1)
    valid = col < tn_ref[...]                         # (TB, N) bool
    dis = jnp.where(valid, dis, jnp.float32(-1e20))

    # ---- softmax over the instance (lane) axis -------------------------------
    m = jnp.max(dis, axis=-1, keepdims=True)          # (TB, 1)
    e = jnp.exp(dis - m)                               # (TB, N)
    s = jnp.sum(e, axis=-1, keepdims=True)             # (TB, 1)
    soft = e * pl.reciprocal(s, approx=True)           # (TB, N) f32 (EUP recip)

    # ---- weighted fusion: VPU multiply + sublane reduce, f32 accumulation ----
    feat = jnp.sum(soft[:, :, None] * x3.astype(jnp.float32), axis=1)  # (TB, D)

    feat_ref[...] = feat.astype(feat_ref.dtype)
    soft_ref[...] = soft.astype(soft_ref.dtype)


def _choose_block_b(B, N, D, dl, itemsize, budget_bytes=40 * 1024 * 1024):
    """Pick block_b (bags per grid step).

    Accounts for the in-kernel intermediates (not just the x block), respects
    the (8, 128) layout constraint on the 2-D output blocks, and prefers an
    even number of grid steps (so both v7x TensorCores stay busy)."""

    def footprint(tb):
        x_block = tb * N * D * itemsize               # pipelined input tile
        xv = tb * N * dl * 4                          # f32 tanh(xV) intermediate
        score_tmps = 4 * tb * N * 4                   # dis / e / soft / where temps
        outs = tb * (D + N) * itemsize                # pipelined output tiles
        params = (D * dl + dl) * itemsize             # V and W row
        tn = tb * 4
        # factor 2: double-buffering on pipelined inputs/outputs.
        return 2 * (x_block + outs + params + tn) + xv + score_tmps

    divisors = [tb for tb in range(1, B + 1) if B % tb == 0]
    # (8, 128) rule: block_b is the second-minor dim of the (block_b, D),
    # (block_b, N) and (block_b, 1) blocks, so it must be a multiple of 8 or
    # cover the whole batch.
    valid = [tb for tb in divisors if tb == B or tb % 8 == 0]
    fitting = [tb for tb in valid if footprint(tb) <= budget_bytes]
    if not fitting:
        # TODO(synk): flash-style N-tiling (online softmax) when even the
        # smallest legal block exceeds the VMEM budget.
        return min(valid)
    even_steps = [tb for tb in fitting if (B // tb) >= 2 and (B // tb) % 2 == 0]
    multi_steps = [tb for tb in fitting if (B // tb) >= 2]
    if even_steps:
        return max(even_steps)
    if multi_steps:
        return max(multi_steps)
    return max(fitting)


def mil_atten_forward(x, V, W, true_num=None, block_b=None, score_in_bf16=False):
    """Pallas implementation of MILAtten.forward.

    Args:
      x: (B, N, D) float
      V: (D, dl)   float
      W: (dl, 1)   float
      true_num: optional int array of shape (B,) (may be traced)
      score_in_bf16: cast the score matmul operands to bf16 (MXU full-rate path)
    Returns:
      feat_fusion: (B, D), soft_assign: (B, N)
    """
    B, N, D = x.shape
    dl = V.shape[1]

    if true_num is None:
        tn2 = jnp.full((B, 1), N, dtype=jnp.int32)
    else:
        tn2 = jnp.asarray(true_num, dtype=jnp.int32).reshape(B, 1)

    # Fold the 1/sqrt(dl) score scale into the (lane-dense) W row.
    w_row = jnp.reshape(W, (1, dl)) * (1.0 / np.sqrt(float(dl)))

    if block_b is None:
        block_b = _choose_block_b(B, N, D, dl, jnp.dtype(x.dtype).itemsize)
    assert B % block_b == 0, "block_b must divide B"

    kernel = functools.partial(_mil_atten_kernel, score_in_bf16=score_in_bf16)

    feat, soft = pl.pallas_call(
        kernel,
        out_shape=(
            jax.ShapeDtypeStruct((B, D), x.dtype),
            jax.ShapeDtypeStruct((B, N), x.dtype),
        ),
        grid=(B // block_b,),
        in_specs=[
            pl.BlockSpec((block_b, N, D), lambda b: (b, 0, 0)),   # x bags
            pl.BlockSpec((block_b, 1), lambda b: (b, 0)),         # true_num
            pl.BlockSpec((D, dl), lambda b: (0, 0)),              # V (shared)
            pl.BlockSpec((1, dl), lambda b: (0, 0)),              # W row (shared)
        ],
        out_specs=(
            pl.BlockSpec((block_b, D), lambda b: (b, 0)),         # feat_fusion
            pl.BlockSpec((block_b, N), lambda b: (b, 0)),         # soft_assign
        ),
        compiler_params=pltpu.CompilerParams(
            dimension_semantics=("parallel",),
            vmem_limit_bytes=64 * 1024 * 1024,
        ),
    )(x, tn2, V, w_row)

    return feat, soft


def mil_atten_reference(x, V, W, true_num=None):
    """Pure-JAX reference matching the PyTorch forward."""
    B, N, D = x.shape
    dl = V.shape[1]
    if true_num is None:
        true_num = jnp.full((B,), N, dtype=jnp.int32)
    mask = jnp.arange(N, dtype=jnp.int32)[None, :] < jnp.asarray(true_num)[:, None]
    x_ = jnp.tanh(jnp.matmul(x, V))                              # (B, N, dl)
    dis = jnp.matmul(x_, W)[..., 0] / np.sqrt(float(dl))          # (B, N)
    dis = jnp.where(mask, dis, -1e20)
    soft = jax.nn.softmax(dis, axis=1)                            # (B, N)
    feat = jnp.sum(soft[..., None] * x, axis=1)                   # (B, D)
    return feat, soft


if __name__ == "__main__":
    # Small shapes consistent with x: B x N x D.
    B, N, D, dl = 2, 8, 32, 128

    key = jax.random.PRNGKey(0)
    kx, kv, kw = jax.random.split(key, 3)

    x = jax.random.normal(kx, (B, N, D), dtype=jnp.float32)

    # Deterministic parameter init mimicking MILAtten.reset_params().
    std1 = 1.0 / np.sqrt(dl * D)
    std2 = 1.0 / np.sqrt(dl)
    V = jax.random.uniform(kv, (D, dl), jnp.float32, -std1, std1)
    W = jax.random.uniform(kw, (dl, 1), jnp.float32, -std2, std2)

    # Ragged bag lengths to exercise the mask path.
    true_num = jnp.array([N, N - 3], dtype=jnp.int32)

    feat, soft = mil_atten_forward(x, V, W, true_num=true_num)
    feat = jax.block_until_ready(feat)
    soft = jax.block_until_ready(soft)

    feat_ref, soft_ref = mil_atten_reference(x, V, W, true_num=true_num)

    # Tolerance accommodates the EUP approx-reciprocal softmax normalization.
    np.testing.assert_allclose(np.asarray(feat), np.asarray(feat_ref),
                               rtol=1e-3, atol=1e-3)
    np.testing.assert_allclose(np.asarray(soft), np.asarray(soft_ref),
                               rtol=1e-3, atol=1e-3)

    print("KERNEL_OK")
</pallas_src>

<mosaic_0001>
module attributes {stable_mosaic.version = 11 : i64} {
  func.func @_mil_atten_kernel(%arg0: i32, %arg1: memref<2x8x32xf32, #tpu.memory_space<vmem>>, %arg2: memref<2x1xi32, #tpu.memory_space<vmem>>, %arg3: memref<32x128xf32, #tpu.memory_space<vmem>>, %arg4: memref<1x128xf32, #tpu.memory_space<vmem>>, %arg5: memref<2x32xf32, #tpu.memory_space<vmem>>, %arg6: memref<2x8xf32, #tpu.memory_space<vmem>>) attributes {dimension_semantics = [#tpu.dimension_semantics<parallel>], iteration_bounds = array<i64: 1>, scalar_prefetch = 0 : i64, scratch_operands = 0 : i64, tpu.core_type = #tpu.core_type<tc>, window_params = [{transform_indices = @transform_0, window_bounds = array<i64: 2, 8, 32>}, {transform_indices = @transform_1, window_bounds = array<i64: 2, 1>}, {pipeline_mode = #tpu.pipeline_mode<synchronous>, transform_indices = @transform_2, window_bounds = array<i64: 32, 128>}, {pipeline_mode = #tpu.pipeline_mode<synchronous>, transform_indices = @transform_3, window_bounds = array<i64: 1, 128>}, {transform_indices = @transform_4, window_bounds = array<i64: 2, 32>}, {transform_indices = @transform_5, window_bounds = array<i64: 2, 8>}]} {
    %c0 = arith.constant 0 : index
    %c0_0 = arith.constant 0 : index
    %c0_1 = arith.constant 0 : index
    %0 = vector.load %arg1[%c0, %c0_0, %c0_1] : memref<2x8x32xf32, #tpu.memory_space<vmem>>, vector<2x8x32xf32>
    %c0_2 = arith.constant 0 : index
    %c0_3 = arith.constant 0 : index
    %1 = vector.load %arg3[%c0_2, %c0_3] : memref<32x128xf32, #tpu.memory_space<vmem>>, vector<32x128xf32>
    %c0_4 = arith.constant 0 : index
    %c0_5 = arith.constant 0 : index
    %2 = vector.load %arg4[%c0_4, %c0_5] : memref<1x128xf32, #tpu.memory_space<vmem>>, vector<1x128xf32>
    %3 = vector.shape_cast %0 : vector<2x8x32xf32> to vector<16x32xf32>
    %cst = arith.constant dense<0.000000e+00> : vector<16x128xf32>
    %4 = tpu.matmul %3, %1, %cst {dimension_numbers = #tpu.dot_dimension_numbers<[1], [0], [0], [1], [0, 0, 1, 1], [], []>} : vector<16x32xf32>, vector<32x128xf32>, vector<16x128xf32> -> vector<16x128xf32>
    %5 = math.tanh %4 : vector<16x128xf32>
    %6 = vector.shape_cast %5 : vector<16x128xf32> to vector<2x8x128xf32>
    %7 = vector.shape_cast %2 : vector<1x128xf32> to vector<1x1x128xf32>
    %8 = vector.broadcast %7 : vector<1x1x128xf32> to vector<2x8x128xf32>
    %9 = arith.mulf %6, %8 : vector<2x8x128xf32>
    %cst_6 = arith.constant dense<0.000000e+00> : vector<2x8xf32>
    %10 = vector.multi_reduction <add>, %9, %cst_6 [2] : vector<2x8x128xf32> to vector<2x8xf32>
    %11 = tpu.iota {dimensions = array<i32: 1>} : vector<2x8xi32>
    %c0_7 = arith.constant 0 : index
    %c0_8 = arith.constant 0 : index
    %12 = vector.load %arg2[%c0_7, %c0_8] : memref<2x1xi32, #tpu.memory_space<vmem>>, vector<2x1xi32>
    %13 = vector.broadcast %12 : vector<2x1xi32> to vector<2x8xi32>
    %14 = arith.cmpi slt, %11, %13 : vector<2x8xi32>
    %cst_9 = arith.constant -1.000000e+20 : f32
    %15 = vector.broadcast %cst_9 : f32 to vector<2x8xf32>
    %16 = arith.select %14, %10, %15 : vector<2x8xi1>, vector<2x8xf32>
    %cst_10 = arith.constant dense<0xFF800000> : vector<2xf32>
    %17 = vector.multi_reduction <maximumf>, %16, %cst_10 [1] : vector<2x8xf32> to vector<2xf32>
    %18 = vector.shape_cast %17 : vector<2xf32> to vector<2x1xf32>
    %19 = vector.broadcast %18 : vector<2x1xf32> to vector<2x8xf32>
    %20 = arith.subf %16, %19 : vector<2x8xf32>
    %21 = math.exp %20 : vector<2x8xf32>
    %cst_11 = arith.constant dense<0.000000e+00> : vector<2xf32>
    %22 = vector.multi_reduction <add>, %21, %cst_11 [1] : vector<2x8xf32> to vector<2xf32>
    %23 = vector.shape_cast %22 : vector<2xf32> to vector<2x1xf32>
    %24 = tpu.reciprocal %23 {approx = true} : vector<2x1xf32> -> vector<2x1xf32>
    %25 = vector.broadcast %24 : vector<2x1xf32> to vector<2x8xf32>
    %26 = arith.mulf %21, %25 : vector<2x8xf32>
    %27 = vector.shape_cast %26 : vector<2x8xf32> to vector<2x8x1xf32>
    %28 = vector.broadcast %27 : vector<2x8x1xf32> to vector<2x8x32xf32>
    %29 = arith.mulf %28, %0 : vector<2x8x32xf32>
    %cst_12 = arith.constant dense<0.000000e+00> : vector<2x32xf32>
    %30 = vector.multi_reduction <add>, %29, %cst_12 [1] : vector<2x8x32xf32> to vector<2x32xf32>
    %c0_13 = arith.constant 0 : index
    %c0_14 = arith.constant 0 : index
    %31 = vector.load %arg5[%c0_13, %c0_14] : memref<2x32xf32, #tpu.memory_space<vmem>>, vector<2x32xf32>
    tpu.vector_store %arg5[%c0_13, %c0_14], %30 {strides = array<i32>} : memref<2x32xf32, #tpu.memory_space<vmem>>, vector<2x32xf32>,
    %c0_15 = arith.constant 0 : index
    %c0_16 = arith.constant 0 : index
    %32 = vector.load %arg6[%c0_15, %c0_16] : memref<2x8xf32, #tpu.memory_space<vmem>>, vector<2x8xf32>
    tpu.vector_store %arg6[%c0_15, %c0_16], %26 {strides = array<i32>} : memref<2x8xf32, #tpu.memory_space<vmem>>, vector<2x8xf32>,
    return
  }
  func.func @transform_0(%arg0: i32) -> (i32, i32, i32) {
    %c0_i32 = arith.constant 0 : i32
    %c0_i32_0 = arith.constant 0 : i32
    %c0_i32_1 = arith.constant 0 : i32
    return %arg0, %c0_i32, %c0_i32_0 : i32, i32, i32
  }
  func.func @transform_1(%arg0: i32) -> (i32, i32) {
    %c0_i32 = arith.constant 0 : i32
    %c0_i32_0 = arith.constant 0 : i32
    return %arg0, %c0_i32 : i32, i32
  }
  func.func @transform_2(%arg0: i32) -> (i32, i32) {
    %c0_i32 = arith.constant 0 : i32
    %c0_i32_0 = arith.constant 0 : i32
    %c0_i32_1 = arith.constant 0 : i32
    return %c0_i32, %c0_i32_0 : i32, i32
  }
  func.func @transform_3(%arg0: i32) -> (i32, i32) {
    %c0_i32 = arith.constant 0 : i32
    %c0_i32_0 = arith.constant 0 : i32
    %c0_i32_1 = arith.constant 0 : i32
    return %c0_i32, %c0_i32_0 : i32, i32
  }
  func.func @transform_4(%arg0: i32) -> (i32, i32) {
    %c0_i32 = arith.constant 0 : i32
    %c0_i32_0 = arith.constant 0 : i32
    return %arg0, %c0_i32 : i32, i32
  }
  func.func @transform_5(%arg0: i32) -> (i32, i32) {
    %c0_i32 = arith.constant 0 : i32
    %c0_i32_0 = arith.constant 0 : i32
    return %arg0, %c0_i32 : i32, i32
  }
}

</mosaic_0001>

<bundles_post_ra>
// kernel: tpu_custom_call.1
= control target key start
LH: loop header
LB: loop body
LE: loop exit
PB: predicated region body
PF: predicated region fallthrough
CT: control target
= control target key end

     0   :  { %11 = vsyncpa [#allocation3], 0  ;;  %s600_s0 = inlined_call_operand.hbm [shape: f32[2,8,32], index: 0, kind: input, shape index: {}]   ;;  %s601_s1 = inlined_call_operand.hbm [shape: s32[2,1], index: 1, kind: input, shape index: {}]   ;;  %s602_s2 = inlined_call_operand.hbm [shape: f32[32,128], index: 2, kind: input, shape index: {}]   ;;  %s603_s3 = inlined_call_operand.hbm [shape: f32[1,128], index: 3, kind: input, shape index: {}]   ;;  %s604_s4 = inlined_call_operand.hbm [shape: f32[2,32], index: 4, kind: output, shape index: {0}]   ;;  %s605_s5 = inlined_call_operand.hbm [shape: f32[2,8], index: 5, kind: output, shape index: {1}]  }
   0x1   :  { %12 = vsyncpa [#allocation6], 0 }
   0x2   :  { %13 = vsyncpa [#allocation9], 0 }
   0x3   :  { %14 = vsyncpa [#allocation4], 0 }
   0x4   :  { %15 = vsyncpa [#allocation12], 0  ;;  %s465_s18 = smov [#allocation5]   ;;  %s466_s20 = smov [#allocation2]  }
   0x5   :  { %s34_s19 = sshll.u32 %s465_s18, 4  ;;  %s21_s21 = sshll.u32 %s466_s20, 4  ;;  %s35_s19 = int_to_ptr.vmem [resolvable:$true] %s34_s19  ;;  %s504_s21 = int_to_ptr.vmem [resolvable:$true] %s21_s21 }
   0x6   :  { %s323_s24 = scalar_lea.hbm %s601_s1, 32 }
   0x7   :  { %p324_p0 = scmp.ne.s32.totalorder %s601_s1, %s323_s24  ;;  %p327_p1 = scmp.lt.u32.totalorder %s323_s24, %s601_s1 }
   0x9   :  { %p329_p2 = pnand %p327_p1, %p324_p0 }
   0xb   :  { %332 = shalt.err (!%p329_p2)
}
   0xc   :  { %s333_s29 = scalar_lea.vmem %s35_s19, 32  ;;  %p338_p4 = scmp.lt.s32.totalorder %s35_s19, %s35_s19 }
   0xd   :  { %p334_p3 = scmp.ne.s32.totalorder %s35_s19, %s333_s29  ;;  %p339_p5 = scmp.lt.s32.totalorder %s333_s29, %s333_s29 }
   0xf   :  { %p340_p6 = por %p339_p5, %p338_p4 }
  0x11   :  { %p341_p7 = pnand %p340_p6, %p334_p3 }
  0x13   :  { %344 = shalt.err (!%p341_p7)
}
  0x14   :  { %37 = dma.hbm_to_vmem [thread:$0]  %s601_s1, 32, %s35_s19, [#allocation6]  }
  0x15   :  { %s345_s9 = scalar_lea.hbm %s600_s0, 256 }
  0x16   :  { %p346_p8 = scmp.ne.s32.totalorder %s600_s0, %s345_s9  ;;  %p349_p9 = scmp.lt.u32.totalorder %s345_s9, %s600_s0 }
  0x18   :  { %p351_p10 = pnand %p349_p9, %p346_p8 }
  0x1a   :  { %354 = shalt.err (!%p351_p10)
}
  0x1b   :  { %s355_s14 = scalar_lea.vmem %s504_s21, 256  ;;  %p360_p12 = scmp.lt.s32.totalorder %s504_s21, %s504_s21 }
  0x1c   :  { %p356_p11 = scmp.ne.s32.totalorder %s504_s21, %s355_s14  ;;  %p361_p13 = scmp.lt.s32.totalorder %s355_s14, %s355_s14 }
  0x1e   :  { %p362_p0 = por %p361_p13, %p360_p12 }
  0x20   :  { %p363_p1 = pnand %p362_p0, %p356_p11 }
  0x22   :  { %366 = shalt.err (!%p363_p1)
}
  0x23   :  { %s467_s1 = smov 128   ;;  %s468_s15 = smov 8  }
  0x24   :  { %27 = dma.hbm_to_vmem [thread:$0]  %s600_s0, 256, %s504_s21, [#allocation3], %s467_s1, %s467_s1, %s468_s15  }
  0x25   :  { %s469_s18 = smov [#allocation7]   ;;  %s470_s20 = smov [#allocation8]  }
  0x26   :  { %s43_s19 = sshll.u32 %s469_s18, 4  ;;  %s56_s22 = sshll.u32 %s470_s20, 4  ;;  %s44_s19 = int_to_ptr.vmem [resolvable:$true] %s43_s19  ;;  %s57_s22 = int_to_ptr.vmem [resolvable:$true] %s56_s22 }
  0x27   :  { %s367_s25 = scalar_lea.hbm %s602_s2, 512 }
  0x28   :  { %p368_p2 = scmp.ne.s32.totalorder %s602_s2, %s367_s25  ;;  %p371_p3 = scmp.lt.u32.totalorder %s367_s25, %s602_s2 }
  0x2a   :  { %p373_p4 = pnand %p371_p3, %p368_p2 }
  0x2c   :  { %376 = shalt.err (!%p373_p4)
}
  0x2d   :  { %s377_s0 = scalar_lea.vmem %s44_s19, 512  ;;  %p382_p6 = scmp.lt.s32.totalorder %s44_s19, %s44_s19 }
  0x2e   :  { %p378_p5 = scmp.ne.s32.totalorder %s44_s19, %s377_s0  ;;  %p383_p7 = scmp.lt.s32.totalorder %s377_s0, %s377_s0 }
  0x30   :  { %p384_p8 = por %p383_p7, %p382_p6 }
  0x32   :  { %p385_p9 = pnand %p384_p8, %p378_p5 }
  0x34   :  { %388 = shalt.err (!%p385_p9)
}
  0x35   :  { %49 = dma.hbm_to_vmem [thread:$0]  %s602_s2, 512, %s44_s19, [#allocation6], %s467_s1, %s467_s1, %s468_s15  }
  0x36   :  { %s389_s8 = scalar_lea.hbm %s603_s3, 16 }
  0x37   :  { %p390_p10 = scmp.ne.s32.totalorder %s603_s3, %s389_s8  ;;  %p393_p11 = scmp.lt.u32.totalorder %s389_s8, %s603_s3 }
  0x39   :  { %p395_p12 = pnand %p393_p11, %p390_p10 }
  0x3b   :  { %398 = shalt.err (!%p395_p12)
}
  0x3c   :  { %s399_s13 = scalar_lea.vmem %s57_s22, 16  ;;  %s403_s14 = scalar_lea.vmem %s57_s22, 32 }
  0x3d   :  { %p400_p13 = scmp.ne.s32.totalorder %s57_s22, %s399_s13  ;;  %p404_p0 = scmp.lt.s32.totalorder %s57_s22, %s57_s22 }
  0x3e   :  { %p405_p1 = scmp.lt.s32.totalorder %s403_s14, %s399_s13 }
  0x40   :  { %p406_p2 = por %p405_p1, %p404_p0 }
  0x42   :  { %p407_p3 = pnand %p406_p2, %p400_p13 }
  0x44   :  { %410 = shalt.err (!%p407_p3)
}
  0x45   :  { %59 = dma.hbm_to_vmem [thread:$0]  %s603_s3, 16, %s57_s22, [#allocation9]  }
  0x46   :  { %455 = dma.done.wait [#allocation3], 256  }
  0x47   :  { %456 = vsyncadd [#allocation3], 4294967040 }
  0x48   :  { %457 = dma.done.wait [#allocation6], 544  }
  0x49   :  { %458 = vsyncadd [#allocation6], 4294966752 }
  0x4a   :  { %459 = dma.done.wait [#allocation9], 16  }
  0x4b   :  { %460 = vsyncadd [#allocation9], 4294967280  ;;  %vm79_vm0 = vcmask 261120   ;;  %v74_v0 = vld [vmem:[#allocation7] sm:$0xff]  ;;  %v75_v1 = vld [vmem:[#allocation7 + $0x8] sm:$0xff]  ;;  %v471_v9 = vmov 0   ;;  %v175_v17 = vlaneseq }
  0x4c   :  { %v76_v2 = vld [vmem:[#allocation7 + $0x10] sm:$0xff]  ;;  %v296_v3 = vpack.c.bf16 %v75_v1, %v74_v0  ;;  %v77_v4 = vld [vmem:[#allocation7 + $0x18] sm:$0xff]  ;;  %313 = vset.pattern.permute.xlu1 %v471_v9  ;;  %314 = vset.pattern.permute.xlu0 %v471_v9  ;;  %v278_v12 = vld [vmem:[#allocation8] ss:$0 sm:$0xff]  ;;  %vm192_vm1 = vcmask 1041409   ;;  %vm196_vm3 = vcmask 58368  }
  0x4d   :  { %v559_v5 = vld [vmem:[#allocation2] sm:$0xff]  ;;  %v300_v6 = vpack.c.bf16 %v77_v4, %v76_v2  ;;  %v563_v7 = vld [vmem:[#allocation2 + $0x8] sm:$0xff]  ;;  %v177_v8 = vld [vmem:[#allocation5] sm:$0x3]  ;;  %v176_v18 = vand.u32 127, %v175_v17  ;;  %v185_v19 = vshrl.u32 %v175_v17, 7 }
  0x4e   :  { %293 = vmatprep.mubr.msk.f32.mxu0 %vm79_vm0, %v559_v5  ;;  %297 = vmatprep.subr.bf16.mxu0 %v296_v3  ;;  %s472_s3 = smov [#allocation11]  }
  0x4f   :  { %299 = vmatpush3.bf16.msra.mxu0 %v296_v3  ;;  %179 = vperm.xlu1 %313, %v177_v8   ;;  %v186_v21 = vsub.s32 %v176_v18, %v185_v19  ;;  %v210_v35 = vsub.s32 0, %v185_v19  ;;  %v217_v39 = vsub.s32 1, %v185_v19  ;;  %s261_s15 = sshll.u32 %s472_s3, 4  ;;  %s262_s15 = int_to_ptr.vmem [resolvable:$true] %s261_s15 }
  0x50   :  { %301 = vmatprep.subr.bf16.mxu0 %v300_v6  ;;  %s411_s16 = scalar_lea.vmem %s262_s15, 32  ;;  %p416_p5 = scmp.lt.s32.totalorder %s262_s15, %s262_s15 }
  0x51   :  { %p412_p4 = scmp.ne.s32.totalorder %s262_s15, %s411_s16  ;;  %p417_p6 = scmp.lt.s32.totalorder %s411_s16, %s411_s16 }
  0x53   :  { %303 = vmatpush3.bf16.msra.mxu0 %v300_v6  ;;  %p418_p7 = por %p417_p6, %p416_p5 }
  0x55   :  { %p419_p8 = pnand %p418_p7, %p412_p4 }
  0x56   :  { %294 = vmatmul.mubr.msk.f32.vlgmr.msra.gmra.mrb[0].mxu0 %vm79_vm0, %v563_v7 }
  0xce   :  { %v180_v22 = vpop.permute.xlu1 %179 }
  0xcf   :  { %vm181_vm2 = vcmp.lt.s32.totalorder %v176_v18, %v180_v22 }
 0x129   :  { %v295_v10 = vpop.f32.mrb[0].mxu0 }
 0x12a   :  { %v152_v11 = vpop.f32.mrb[1].mxu0 }
 0x12b   :  { %315 = vtanh.f32 %v152_v11 }
 0x12c   :  { %317 = vtanh.f32 %v295_v10 }
 0x135   :  { %v316_v13 = vpop.eup %315 }
 0x136   :  { %v169_v14 = vmul.f32 %v316_v13, %v278_v12  ;;  %v318_v15 = vpop.eup %317 }
 0x137   :  { %v170_v16 = vmul.f32 %v318_v15, %v278_v12 }
 0x138   :  { %171 = vadd.xlane.f32.xlu0 %v169_v14 }
 0x13c   :  { %173 = vadd.xlane.f32.xlu0 %v170_v16 }
 0x1c5   :  { %v172_v20 = vpop.xlane.xlu0 %171 }
 0x1c6   :  { %v187_v24 = vrot.slane %v172_v20, %v186_v21 }
 0x1c9   :  { %v174_v23 = vpop.xlane.xlu0 %173 }
 0x1ca   :  { %v191_v25 = vrot.slane %v174_v23, %v186_v21 }
 0x1cc   :  { %v193_v26 = vsel %vm192_vm1, %v191_v25, %v187_v24 }
 0x1cd   :  { %v195_v27 = vsel %vm181_vm2, %v193_v26, -1e+20 }
 0x1ce   :  { %v197_v28 = vsel %vm196_vm3, %v195_v27, -inf }
 0x1cf   :  { %198 = vmax.xlane.f32.xlu1 %v197_v28 }
 0x25c   :  { %v199_v29 = vpop.xlane.xlu1 %198 }
 0x25d   :  { %v200_v30 = vsub.f32 %v195_v27, %v199_v29 }
 0x25f   :  { %v201_v31 = vmul.f32 1.442695, %v200_v30 }
 0x261   :  { %319 = vpow2.f32 %v201_v31 }
 0x26b   :  { %v320_v32 = vpop.eup %319 }
 0x26c   :  { %v203_v33 = vsel %vm196_vm3, %v320_v32, 0.0 }
 0x26d   :  { %204 = vadd.xlane.f32.xlu0 %v203_v33 }
 0x2fa   :  { %v205_v34 = vpop.xlane.xlu0 %204 }
 0x2fb   :  { %321 = vrcp.f32 %v205_v34 }
 0x305   :  { %v322_v36 = vpop.eup %321 }
 0x306   :  { %v207_v37 = vmul.f32 %v322_v36, %v320_v32 }
 0x308   :  { %v211_v38 = vrot.slane %v207_v37, %v210_v35  ;;  %244 = vst.msk [vmem:[#allocation11] sm:$0x3] %vm196_vm3, %v207_v37  ;;  %v218_v40 = vrot.slane %v207_v37, %v217_v39 }
 0x30a   :  { %213 = vbcast.lane.b32.xlu0 %v211_v38, 256 }
 0x30e   :  { %220 = vbcast.lane.b32.xlu0 %v218_v40, 256 }
 0x30f   :  { %422 = shalt.err (!%p419_p8)
}
 0x310   :  { %s423_s19 = scalar_lea.hbm %s605_s5, 32 }
 0x311   :  { %p424_p9 = scmp.ne.s32.totalorder %s605_s5, %s423_s19  ;;  %p427_p10 = scmp.lt.u32.totalorder %s423_s19, %s605_s5 }
 0x313   :  { %p429_p11 = pnand %p427_p10, %p424_p9 }
 0x315   :  { %432 = shalt.err (!%p429_p11)
}
 0x316   :  { %264 = dma.vmem_to_hbm [thread:$0]  %s262_s15, 32, %s605_s5, [#allocation12]   ;;  %vm242_vm4 = vcmask 254976  }
 0x317   :  { %s473_s5 = smov [#allocation10]  }
 0x318   :  { %s251_s27 = sshll.u32 %s473_s5, 4  ;;  %s252_s27 = int_to_ptr.vmem [resolvable:$true] %s251_s27 }
 0x319   :  { %s433_s28 = scalar_lea.vmem %s252_s27, 32  ;;  %p438_p13 = scmp.lt.s32.totalorder %s252_s27, %s252_s27 }
 0x31a   :  { %p434_p12 = scmp.ne.s32.totalorder %s252_s27, %s433_s28  ;;  %p439_p0 = scmp.lt.s32.totalorder %s433_s28, %s433_s28 }
 0x31c   :  { %p440_p1 = por %p439_p0, %p438_p13 }
 0x31e   :  { %p441_p2 = pnand %p440_p1, %p434_p12 }
 0x37c   :  { %v214_v41 = vpop.permute.xlu0 %213 }
 0x37d   :  { %v222_v42 = vmul.f32 %v214_v41, %v559_v5 }
 0x37f   :  { %v224_v43 = vsel %vm79_vm0, %v222_v42, 0.0 }
 0x380   :  { %v225_v44 = vrot.slane %v224_v43, 4  ;;  %v221_v45 = vpop.permute.xlu0 %220 }
 0x381   :  { %v223_v46 = vmul.f32 %v221_v45, %v563_v7 }
 0x382   :  { %v226_v47 = vadd.f32 %v225_v44, %v224_v43 }
 0x383   :  { %v231_v48 = vsel %vm79_vm0, %v223_v46, 0.0 }
 0x384   :  { %v227_v49 = vrot.slane %v226_v47, 2  ;;  %v232_v50 = vrot.slane %v231_v48, 4 }
 0x386   :  { %v228_v51 = vadd.f32 %v227_v49, %v226_v47  ;;  %v233_v52 = vadd.f32 %v232_v50, %v231_v48 }
 0x388   :  { %v234_v53 = vrot.slane %v233_v52, 2  ;;  %v229_v54 = vrot.slane %v228_v51, 1 }
 0x38a   :  { %v235_v55 = vadd.f32 %v234_v53, %v233_v52  ;;  %v230_v57 = vadd.f32 %v229_v54, %v228_v51 }
 0x38c   :  { %v236_v56 = vrot.slane %v235_v55, 1 }
 0x38e   :  { %v237_v58 = vadd.f32 %v236_v56, %v235_v55 }
 0x390   :  { %v240_v59 = vsel %vm192_vm1, %v237_v58, %v230_v57 }
 0x391   :  { %243 = vst.msk [vmem:[#allocation10] sm:$0x3] %vm242_vm4, %v240_v59 }
 0x392   :  { %444 = shalt.err (!%p441_p2)
}
 0x393   :  { %s445_s21 = scalar_lea.hbm %s604_s4, 32 }
 0x394   :  { %p446_p3 = scmp.ne.s32.totalorder %s604_s4, %s445_s21  ;;  %p449_p4 = scmp.lt.u32.totalorder %s445_s21, %s604_s4 }
 0x396   :  { %p451_p5 = pnand %p449_p4, %p446_p3 }
 0x398   :  { %454 = shalt.err (!%p451_p5)
}
 0x399   :  { %254 = dma.vmem_to_hbm [thread:$0]  %s252_s27, 32, %s604_s4, [#allocation4]  }
 0x39a   :  { %461 = dma.done.wait [#allocation4], 32  }
 0x39b   :  { %462 = vsyncadd [#allocation4], 4294967264 }
 0x39c   :  { %463 = dma.done.wait [#allocation12], 32  }
 0x39d   :  { %464 = vsyncadd [#allocation12], 4294967264 }
 0x39e   :  { %271 = vsyncpa [#allocation3], 1 }
 0x39f   :  { %272 = vsyncpa [#allocation6], 1 }
 0x3a0   :  { %273 = vsyncpa [#allocation9], 1 }
 0x3a1   :  { %274 = vsyncpa [#allocation4], 1 }
 0x3a2   :  { %275 = vsyncpa [#allocation12], 1 }

</bundles_post_ra>
